<compile_context>
chip_gen: v6e
topology: v6e:2x2x1
jax: 0.10.0
libtpu: 0.0.40
codegen_flags: <defaults>
</compile_context>

<pallas_src>
import jax
import jax.numpy as jnp
from jax.experimental import pallas as pl
from jax.experimental.pallas import tpu as pltpu

_TARGET_BLOCK_BYTES = 2 * 1024 * 1024   # ~2 MiB data block
_MAX_TILE_ROWS = 512                    # sublane-axis cap (multiple of 8)


def _round_up(x: int, m: int) -> int:
    return -(-x // m) * m


def _round_down(x: int, m: int) -> int:
    return (x // m) * m


def _pick_tiles(rows: int, cols: int, itemsize: int):
    """Byte-budget, lane-aligned, balanced tile selection (static shapes)."""
    # Row tile: full extent when small, otherwise balanced multiples of 8.
    if rows <= _MAX_TILE_ROWS:
        tile_rows = rows
    else:
        n_row_blocks = -(-rows // _MAX_TILE_ROWS)
        tile_rows = _round_up(-(-rows // n_row_blocks), 8)
    # Column tile from the byte budget (grows when rows is small), then
    # re-balanced so the boundary block is not a nearly-empty masked sliver.
    if cols <= 128:
        tile_cols = cols  # full (short) lane extent
    else:
        budget_cols = max(
            128, _round_down(_TARGET_BLOCK_BYTES // max(1, tile_rows * itemsize), 128))
        n_col_blocks = -(-cols // budget_cols)
        tile_cols = min(_round_up(-(-cols // n_col_blocks), 128),
                        _round_up(cols, 128))
    return tile_rows, tile_cols


def _compose_kernel(x_ref, scale_ref, shift_ref, scal_ref, o_ref):
    # x_ref/o_ref:  (tile_rows, tile_cols) VMEM blocks of the (N*C, H*W) view.
    # scale_ref:    (tile_rows, 1) f32 VMEM -> per-row inv_std
    # shift_ref:    (tile_rows, 1) f32 VMEM -> per-row mean * inv_std
    # scal_ref:     (4,) f32 SMEM -> [low, high, gamma, beta]
    x = x_ref[...].astype(jnp.float32)
    # Transform 1: per-channel normalize, folded: (x - mean)/std == x*s - m*s
    y = x * scale_ref[...] - shift_ref[...]
    # Transform 2: clamp
    y = jnp.minimum(jnp.maximum(y, scal_ref[0]), scal_ref[1])
    # Transform 3: global affine; store in the original I/O dtype
    o_ref[...] = (y * scal_ref[2] + scal_ref[3]).astype(o_ref.dtype)


@jax.jit
def _composed_pipeline(data, scale_c, shift_c, scalars):
    """One fused, tiled Pallas pass over batch['data'] (NCHW)."""
    N, C, H, W = data.shape
    rows, cols = N * C, H * W
    # 2D view: (batch, channel) rows on the sublane axis, H*W on the lane axis.
    x2d = data.reshape(rows, cols)

    # Per-row params so tile_rows is decoupled from C (no in-kernel selects);
    # extra HBM traffic is rows*8 bytes -- negligible.
    scale_rows = jnp.tile(scale_c, N).reshape(rows, 1)
    shift_rows = jnp.tile(shift_c, N).reshape(rows, 1)

    tile_rows, tile_cols = _pick_tiles(rows, cols, data.dtype.itemsize)
    grid = (pl.cdiv(rows, tile_rows), pl.cdiv(cols, tile_cols))

    out2d = pl.pallas_call(
        _compose_kernel,
        out_shape=jax.ShapeDtypeStruct((rows, cols), data.dtype),
        grid=grid,
        in_specs=[
            pl.BlockSpec((tile_rows, tile_cols), lambda i, j: (i, j)),
            pl.BlockSpec((tile_rows, 1), lambda i, j: (i, 0)),   # scale rows
            pl.BlockSpec((tile_rows, 1), lambda i, j: (i, 0)),   # shift rows
            pl.BlockSpec(memory_space=pltpu.MemorySpace.SMEM),   # scalars (4,)
        ],
        out_specs=pl.BlockSpec((tile_rows, tile_cols), lambda i, j: (i, j)),
        input_output_aliases={0: 0},  # elementwise: out replaces batch["data"]
        compiler_params=pltpu.CompilerParams(
            dimension_semantics=("parallel", "parallel")),
        cost_estimate=pl.CostEstimate(
            flops=6 * rows * cols,
            bytes_accessed=2 * rows * cols * int(data.dtype.itemsize),
            transcendentals=0),
    )(x2d, scale_rows, shift_rows, scalars)

    return out2d.reshape(N, C, H, W)


def compose_forward(batch, mean_c, std_c, low, high, gamma, beta, eps=1e-12):
    """Applies the composed transform chain to batch['data'] via one Pallas call."""
    data = batch["data"]
    # Precompute per-channel reciprocal outside the kernel (no per-element
    # divide / EUP traffic); guard std == 0 with an epsilon.
    inv_std = 1.0 / jnp.maximum(std_c.astype(jnp.float32), eps)
    scale_c = inv_std                                   # (C,)
    shift_c = mean_c.astype(jnp.float32) * inv_std      # (C,)
    scalars = jnp.array([low, high, gamma, beta], dtype=jnp.float32)

    # Compose returns the (transformed) batch dict.
    out = dict(batch)
    out["data"] = _composed_pipeline(data, scale_c, shift_c, scalars)
    return out


def _reference(data, mean_c, std_c, low, high, gamma, beta):
    y = (data.astype(jnp.float32) - mean_c[None, :, None, None]) / std_c[None, :, None, None]
    y = jnp.clip(y, low, high)
    return (y * gamma + beta).astype(data.dtype)


def _run_case(key, N, C, H, W, mean_c, std_c, low, high, gamma, beta,
              dtype=jnp.float32, atol=1e-5, rtol=1e-5):
    data = (jax.random.normal(key, (N, C, H, W), dtype=jnp.float32) * 3.0 + 1.0).astype(dtype)
    ref = _reference(data, mean_c, std_c, low, high, gamma, beta)
    out = compose_forward({"data": data}, mean_c, std_c, low, high, gamma, beta)
    jax.block_until_ready(out["data"])
    assert out["data"].shape == (N, C, H, W)
    assert out["data"].dtype == data.dtype
    assert jnp.allclose(out["data"].astype(jnp.float32), ref.astype(jnp.float32),
                        atol=atol, rtol=rtol)


if __name__ == "__main__":
    key = jax.random.PRNGKey(0)
    k1, k2, k3, k4 = jax.random.split(key, 4)

    low, high = -2.0, 2.0
    gamma, beta = 1.25, 0.1

    # Primary small case: N=2, C=4, 16x16 (single grid step).
    mean4 = jnp.array([0.5, -0.25, 1.0, 0.0], dtype=jnp.float32)
    std4 = jnp.array([1.5, 2.0, 0.75, 1.0], dtype=jnp.float32)
    _run_case(k1, 2, 4, 16, 16, mean4, std4, low, high, gamma, beta)

    # Small-N*C with larger spatial extent: byte-budget tiling keeps a single
    # wide lane-dense block instead of many tiny column blocks.
    _run_case(k2, 2, 2, 64, 64, mean4[:2], std4[:2], low, high, gamma, beta)

    # Row + column blocking with balanced boundary blocks and non-power-of-2 C
    # (rows=600 -> 2 balanced row blocks; cols=1600 -> 2 balanced col blocks).
    mean3 = jnp.array([0.5, -0.25, 1.0], dtype=jnp.float32)
    std3 = jnp.array([1.5, 2.0, 0.75], dtype=jnp.float32)
    _run_case(k3, 200, 3, 40, 40, mean3, std3, low, high, gamma, beta)

    # Same chain with bf16 storage of batch['data'] (halves HBM traffic;
    # compute stays f32 in-kernel, I/O dtype preserved).
    _run_case(k4, 2, 4, 32, 32, mean4, std4, low, high, gamma, beta,
              dtype=jnp.bfloat16, atol=5e-2, rtol=5e-2)

    # TODO(synk): Compose is transform-agnostic; arbitrary user transforms
    # (e.g. spatial augmentations) would each need their own kernel -- here the
    # representative elementwise chain is fused into a single tiled Pallas pass.
    print("KERNEL_OK")
</pallas_src>

<mosaic_0001>
module attributes {stable_mosaic.version = 11 : i64} {
  func.func @_compose_kernel(%arg0: i32, %arg1: i32, %arg2: memref<8x256xf32, #tpu.memory_space<vmem>>, %arg3: memref<8x1xf32, #tpu.memory_space<vmem>>, %arg4: memref<8x1xf32, #tpu.memory_space<vmem>>, %arg5: memref<4xf32, #tpu.memory_space<smem>>, %arg6: memref<8x256xf32, #tpu.memory_space<vmem>>) attributes {dimension_semantics = [#tpu.dimension_semantics<parallel>, #tpu.dimension_semantics<parallel>], iteration_bounds = array<i64: 1, 1>, scalar_prefetch = 0 : i64, scratch_operands = 0 : i64, tpu.core_type = #tpu.core_type<tc>, window_params = [{transform_indices = @transform_0, window_bounds = array<i64: 8, 256>}, {transform_indices = @transform_1, window_bounds = array<i64: 8, 1>}, {transform_indices = @transform_2, window_bounds = array<i64: 8, 1>}, {transform_indices = @transform_3, window_bounds = array<i64: 4>}, {transform_indices = @transform_4, window_bounds = array<i64: 8, 256>}]} {
    %c0 = arith.constant 0 : index
    %c0_0 = arith.constant 0 : index
    %0 = vector.load %arg2[%c0, %c0_0] : memref<8x256xf32, #tpu.memory_space<vmem>>, vector<8x256xf32>
    %c0_1 = arith.constant 0 : index
    %c0_2 = arith.constant 0 : index
    %1 = vector.load %arg3[%c0_1, %c0_2] : memref<8x1xf32, #tpu.memory_space<vmem>>, vector<8x1xf32>
    %2 = vector.broadcast %1 : vector<8x1xf32> to vector<8x256xf32>
    %3 = arith.mulf %0, %2 : vector<8x256xf32>
    %c0_3 = arith.constant 0 : index
    %c0_4 = arith.constant 0 : index
    %4 = vector.load %arg4[%c0_3, %c0_4] : memref<8x1xf32, #tpu.memory_space<vmem>>, vector<8x1xf32>
    %5 = vector.broadcast %4 : vector<8x1xf32> to vector<8x256xf32>
    %6 = arith.subf %3, %5 : vector<8x256xf32>
    %c0_5 = arith.constant 0 : index
    %7 = memref.load %arg5[%c0_5] : memref<4xf32, #tpu.memory_space<smem>>
    %8 = vector.broadcast %7 : f32 to vector<8x256xf32>
    %9 = arith.maximumf %6, %8 : vector<8x256xf32>
    %c1 = arith.constant 1 : index
    %10 = memref.load %arg5[%c1] : memref<4xf32, #tpu.memory_space<smem>>
    %11 = vector.broadcast %10 : f32 to vector<8x256xf32>
    %12 = arith.minimumf %9, %11 : vector<8x256xf32>
    %c2 = arith.constant 2 : index
    %13 = memref.load %arg5[%c2] : memref<4xf32, #tpu.memory_space<smem>>
    %14 = vector.broadcast %13 : f32 to vector<8x256xf32>
    %15 = arith.mulf %12, %14 : vector<8x256xf32>
    %c3 = arith.constant 3 : index
    %16 = memref.load %arg5[%c3] : memref<4xf32, #tpu.memory_space<smem>>
    %17 = vector.broadcast %16 : f32 to vector<8x256xf32>
    %18 = arith.addf %15, %17 : vector<8x256xf32>
    %c0_6 = arith.constant 0 : index
    %c0_7 = arith.constant 0 : index
    %19 = vector.load %arg6[%c0_6, %c0_7] : memref<8x256xf32, #tpu.memory_space<vmem>>, vector<8x256xf32>
    tpu.vector_store %arg6[%c0_6, %c0_7], %18 {strides = array<i32>} : memref<8x256xf32, #tpu.memory_space<vmem>>, vector<8x256xf32>,
    return
  }
  func.func @transform_0(%arg0: i32, %arg1: i32) -> (i32, i32) {
    %c0_i32 = arith.constant 0 : i32
    return %arg0, %arg1 : i32, i32
  }
  func.func @transform_1(%arg0: i32, %arg1: i32) -> (i32, i32) {
    %c0_i32 = arith.constant 0 : i32
    %c0_i32_0 = arith.constant 0 : i32
    return %arg0, %c0_i32 : i32, i32
  }
  func.func @transform_2(%arg0: i32, %arg1: i32) -> (i32, i32) {
    %c0_i32 = arith.constant 0 : i32
    %c0_i32_0 = arith.constant 0 : i32
    return %arg0, %c0_i32 : i32, i32
  }
  func.func @transform_3(%arg0: i32, %arg1: i32) -> i32 {
    %c0_i32 = arith.constant 0 : i32
    %c0_i32_0 = arith.constant 0 : i32
    return %c0_i32 : i32
  }
  func.func @transform_4(%arg0: i32, %arg1: i32) -> (i32, i32) {
    %c0_i32 = arith.constant 0 : i32
    return %arg0, %arg1 : i32, i32
  }
}

</mosaic_0001>

<bundles_post_ra>
// kernel: tile.1
= control target key start
LH: loop header
LB: loop body
LE: loop exit
PB: predicated region body
PF: predicated region fallthrough
CT: control target
= control target key end

     0   :  { %s35_s8 = smov 125   ;;  %vm8_vm0 = vcmask 7168   ;;  %s36_s11 = smov 126   ;;  %s62_s0 = inlined_call_operand.vmem [shape: f32[2,4], index: 0, kind: input, shape index: {}]   ;;  %s63_s1 = inlined_call_operand.vmem [shape: f32[8,1], index: 1, kind: output, shape index: {}]  }
   0x1   :  { %v5_v0 = vld [vmem:[%s62_s0] sm:$0x3]  ;;  %s34_s0 = smov 127  }
   0x2   :  { %6 = vst [vmem:[#allocation0] sm:$0x3] %v5_v0 }
   0x9   :  { %v10_v1 = vld [vmem:[#allocation0] sm:$0x3]  }
   0xa   :  { %v22_v2 = vld [vmem:[#allocation0] sm:$0x3]   ;;  %11 = vrot.lane.b32.xlu0 %v10_v1, %s34_s0 }
   0xb   :  { %23 = vrot.lane.b32.xlu1 %v22_v2, %s35_s8  ;;  %v7_v3 = vld [vmem:[#allocation0] sm:$0x3]  }
   0xc   :  { %v16_v4 = vld [vmem:[#allocation0] sm:$0x3]   ;;  %9 = vst.msk [vmem:[%s63_s1] ss:$4 sm:$0x3] %vm8_vm0, %v7_v3  }
   0xe   :  { %17 = vrot.lane.b32.xlu0 %v16_v4, %s36_s11 }
  0x7c   :  { %v12_v5 = vpop.permute.xlu0 %11  }
  0x7d   :  { %v24_v6 = vpop.permute.xlu1 %23   ;;  %28 = vst.msk [vmem:[%s63_s1 + $0x1] ss:$4 sm:$0x3] %vm8_vm0, %v12_v5  }
  0x7e   :  { %30 = vst.msk [vmem:[%s63_s1 + $0x3] ss:$4 sm:$0x3] %vm8_vm0, %v24_v6  }
  0x80   :  { %v18_v7 = vpop.permute.xlu0 %17  }
  0x81   :  { %29 = vst.msk [vmem:[%s63_s1 + $0x2] ss:$4 sm:$0x3] %vm8_vm0, %v18_v7  }

// kernel: tile.13
= control target key start
LH: loop header
LB: loop body
LE: loop exit
PB: predicated region body
PF: predicated region fallthrough
CT: control target
= control target key end

     0   :  { %s22_s0 = inlined_call_operand.vmem [shape: f32[4], index: 0, kind: input, shape index: {}]   ;;  %s23_s1 = inlined_call_operand.vmem [shape: f32[2,4], index: 1, kind: output, shape index: {}]  }
   0x1   :  { %v4_v0 = vld [vmem:[%s22_s0] ss:$0 sm:$0xff] }
   0x2   :  { %5 = vst [vmem:[%s23_s1] sm:$0x3] %v4_v0 }

// kernel: _composed_pipeline.1
= control target key start
LH: loop header
LB: loop body
LE: loop exit
PB: predicated region body
PF: predicated region fallthrough
CT: control target
= control target key end

     0   :  { %9 = vsyncpa [#allocation3], 0  ;;  %s139_s0 = inlined_call_operand.vmem [shape: f32[8,256], index: 0, kind: input, shape index: {}, may-alias: {0,4}]   ;;  %s140_s1 = inlined_call_operand.vmem [shape: f32[8,1], index: 1, kind: input, shape index: {}]   ;;  %s141_s2 = inlined_call_operand.vmem [shape: f32[8,1], index: 2, kind: input, shape index: {}]   ;;  %s142_s3 = inlined_call_operand.vmem [shape: f32[4], index: 3, kind: input, shape index: {}]   ;;  %s143_s4 = inlined_call_operand.vmem [shape: f32[8,256], index: 4, kind: output, shape index: {}, may-alias: {0,4}]  }
   0x1   :  { %s22_s17 = sshll.u32 %s142_s3, 4  ;;  %s23_s17 = int_to_ptr.vmem [resolvable:$true] %s22_s17 }
   0x2   :  { %s77_s18 = scalar_lea.vmem %s23_s17, 16  ;;  %p82_p1 = scmp.lt.s32.totalorder %s23_s17, %s23_s17 }
   0x3   :  { %p78_p0 = scmp.ne.s32.totalorder %s23_s17, %s77_s18  ;;  %p83_p2 = scmp.lt.s32.totalorder %s77_s18, %s77_s18 }
   0x5   :  { %p84_p3 = por %p83_p2, %p82_p1 }
   0x7   :  { %p85_p4 = pnand %p84_p3, %p78_p0 }
   0x9   :  { %88 = shalt.err (!%p85_p4)
}
   0xa   :  { %s91_s19 = smov [#allocation2]  }
   0xb   :  { %25 = dma.vmem_to_smem %s23_s17, 16, %s91_s19, [#allocation3]  }
   0xc   :  { %89 = dma.done.wait [#allocation3], 16  }
   0xd   :  { %90 = vsyncadd [#allocation3], 4294967280 }
   0xe   :  { %29 = sfence }
   0xf   :  { %v32_v0 = vld [vmem:[%s140_s1] sm:$0xff]  ;;  %v92_v1 = vmov 0   ;;  %s48_s23 = sld [smem:[#allocation2]]  ;;  %v31_v5 = vld [vmem:[%s139_s0 + $0x8] sm:$0xff] }
  0x10   :  { %76 = vset.pattern.permute.xlu0 %v92_v1  ;;  %v40_v2 = vld [vmem:[%s141_s2] sm:$0xff]  ;;  %s71_s24 = sld [smem:[#allocation2 + $0x1]] }
  0x11   :  { %35 = vperm.xlu0 %76, %v32_v0   ;;  %v30_v4 = vld [vmem:[%s139_s0] sm:$0xff]  ;;  %s72_s1 = sld [smem:[#allocation2 + $0x2]] }
  0x12   :  { %s73_s29 = sld [smem:[#allocation2 + $0x3]] }
  0x15   :  { %43 = vperm.xlu0 %76, %v40_v2   ;;  %v49_v8 = vstv %s48_s23 }
  0x16   :  { %v53_v12 = vstv %s71_s24 }
  0x17   :  { %v57_v15 = vstv %s72_s1 }
  0x18   :  { %v61_v18 = vstv %s73_s29 }
  0x8c   :  { %v36_v3 = vpop.permute.xlu0 %35 }
  0x8d   :  { %v38_v6 = vmul.f32 %v36_v3, %v30_v4  ;;  %v39_v7 = vmul.f32 %v36_v3, %v31_v5 }
  0x90   :  { %v44_v9 = vpop.permute.xlu0 %43 }
  0x91   :  { %v46_v10 = vsub.f32 %v38_v6, %v44_v9  ;;  %v47_v11 = vsub.f32 %v39_v7, %v44_v9 }
  0x93   :  { %v50_v13 = vmax.f32 %v46_v10, %v49_v8  ;;  %v51_v14 = vmax.f32 %v47_v11, %v49_v8 }
  0x95   :  { %v54_v16 = vmin.f32 %v50_v13, %v53_v12  ;;  %v55_v17 = vmin.f32 %v51_v14, %v53_v12 }
  0x97   :  { %v58_v19 = vmul.f32 %v57_v15, %v54_v16  ;;  %v59_v20 = vmul.f32 %v57_v15, %v55_v17 }
  0x99   :  { %v62_v21 = vadd.f32 %v61_v18, %v58_v19  ;;  %v63_v22 = vadd.f32 %v61_v18, %v59_v20 }
  0x9b   :  { %64 = vst [vmem:[%s143_s4] sm:$0xff] %v62_v21  ;;  %65 = vst [vmem:[%s143_s4 + $0x8] sm:$0xff] %v63_v22 }
  0x9c   :  { %70 = vsyncpa [#allocation3], 1 }

</bundles_post_ra>
